<compile_context>
chip_gen: v7x
topology: tpu7x:2x2x1
jax: 0.10.0
libtpu: 0.0.40
codegen_flags: <defaults>
</compile_context>

<pallas_src>
import math

import jax
import jax.numpy as jnp
from jax.experimental import pallas as pl
from jax.experimental.pallas import tpu as pltpu


# -- thresholds ---------------------------------------------------------------
_SMALL_COPY_BYTES = 1 << 20    # below this, skip Pallas; plain XLA copy
_CHUNK_SPLIT_BYTES = 8 << 20   # above this, split the tensor into N DMAs
_MAX_CHUNKS = 8                # max concurrent DMAs per tensor


def _nbytes(x) -> int:
    return int(x.size) * jnp.dtype(x.dtype).itemsize


def _chunk_plan(shape, dtype):
    """Static list of (start, size) slices along dim 0; [(0, None)] = whole tensor."""
    nbytes = math.prod(shape) * jnp.dtype(dtype).itemsize if shape else 0
    lead = shape[0] if len(shape) > 0 else 1
    if nbytes < _CHUNK_SPLIT_BYTES or lead <= 1:
        return [(0, None)]
    n = min(_MAX_CHUNKS, lead)
    base, rem = divmod(lead, n)
    plan, start = [], 0
    for i in range(n):
        size = base + (1 if i < rem else 0)
        plan.append((start, size))
        start += size
    return plan


def _build_copy_kernel(p_plan, l_plan, p_bytes, l_bytes):
    """Kernel closure: issue all DMAs, then wait smaller-tensor chunks first."""
    n_sems = len(p_plan) + len(l_plan)

    def kernel(p_in, l_in, p_out, l_out, sems):
        copies = []
        sem_i = 0
        for tag, plan, src, dst in (("p", p_plan, p_in, p_out),
                                    ("l", l_plan, l_in, l_out)):
            for start, size in plan:
                if size is None:
                    cp = pltpu.make_async_copy(src, dst, sems.at[sem_i])
                else:
                    cp = pltpu.make_async_copy(
                        src.at[pl.ds(start, size)],
                        dst.at[pl.ds(start, size)],
                        sems.at[sem_i],
                    )
                copies.append((tag, cp))
                sem_i += 1

        # Start every DMA before waiting on any (maximal concurrency).
        for _, cp in copies:
            cp.start()

        # Wait the smaller tensor's DMAs first so the TC acknowledges the
        # short copy without idling behind the long one.
        first = "p" if p_bytes <= l_bytes else "l"
        for tag, cp in copies:
            if tag == first:
                cp.wait()
        for tag, cp in copies:
            if tag != first:
                cp.wait()

    return kernel, n_sems


def _pallas_copy(perception: jax.Array, ltm: jax.Array):
    """One Pallas call: direct HBM->HBM DMA copy of both tensors (no VMEM)."""
    p_bytes = _nbytes(perception)
    l_bytes = _nbytes(ltm)
    p_plan = _chunk_plan(perception.shape, perception.dtype)
    l_plan = _chunk_plan(ltm.shape, ltm.dtype)
    kernel, n_sems = _build_copy_kernel(p_plan, l_plan, p_bytes, l_bytes)

    return pl.pallas_call(
        kernel,
        out_shape=(
            jax.ShapeDtypeStruct(perception.shape, perception.dtype),
            jax.ShapeDtypeStruct(ltm.shape, ltm.dtype),
        ),
        # Leave operands/results in place (HBM); the kernel moves the bytes
        # itself with DMA engines — no VMEM staging, no grid.
        in_specs=[
            pl.BlockSpec(memory_space=pl.ANY),
            pl.BlockSpec(memory_space=pl.ANY),
        ],
        out_specs=(
            pl.BlockSpec(memory_space=pl.ANY),
            pl.BlockSpec(memory_space=pl.ANY),
        ),
        scratch_shapes=[pltpu.SemaphoreType.DMA((n_sems,))],
        cost_estimate=pl.CostEstimate(
            flops=0,
            transcendentals=0,
            bytes_accessed=2 * (p_bytes + l_bytes),  # read + write per tensor
        ),
    )(perception, ltm)


def memory_identity_copy(perception: jax.Array, ltm: jax.Array, *,
                         force_pallas: bool = False):
    """Materialize fresh output buffers with the same contents.

    Small tensors (< ~1 MiB total) bypass Pallas: the custom-call launch
    overhead dominates and XLA can often fuse/alias the copy away.
    """
    if perception.shape[0] != ltm.shape[0]:
        raise ValueError(
            f"batch mismatch: perception batch {perception.shape[0]} vs "
            f"ltm batch {ltm.shape[0]}"
        )
    total = _nbytes(perception) + _nbytes(ltm)
    if total < _SMALL_COPY_BYTES and not force_pallas:
        return jnp.copy(perception), jnp.copy(ltm)
    return _pallas_copy(perception, ltm)


def memory_identity(perception: jax.Array, ltm: jax.Array, *,
                    materialize: bool = False, force_pallas: bool = False):
    """Equivalent of MemoryIdentity.forward.

    Default is a true no-op (zero kernel launches, zero HBM traffic). Only
    set materialize=True when a physically fresh buffer is required (e.g.
    buffer-donation situations).
    """
    if perception.shape[0] != ltm.shape[0]:
        raise ValueError(
            f"batch mismatch: perception batch {perception.shape[0]} vs "
            f"ltm batch {ltm.shape[0]}"
        )
    if not materialize:
        return perception, ltm
    return memory_identity_copy(perception, ltm, force_pallas=force_pallas)


if __name__ == "__main__":
    key = jax.random.PRNGKey(0)
    k1, k2 = jax.random.split(key)

    # Small shapes consistent with a perception / long-term-memory interface:
    # perception: (batch=2, seq=8, hidden=32); ltm: (batch=2, slots=16, hidden=32)
    perception = jax.random.normal(k1, (2, 8, 32), dtype=jnp.float32)
    ltm = jax.random.normal(k2, (2, 16, 32), dtype=jnp.float32)

    # 1) Zero-cost identity path (the recommended default).
    out_p, out_l = memory_identity(perception, ltm)
    jax.block_until_ready((out_p, out_l))
    assert out_p.shape == perception.shape and out_l.shape == ltm.shape
    assert jnp.array_equal(out_p, perception)
    assert jnp.array_equal(out_l, ltm)

    # 2) Small-size bypass path (materialized, but no Pallas launch).
    sm_p, sm_l = memory_identity(perception, ltm, materialize=True)
    jax.block_until_ready((sm_p, sm_l))
    assert jnp.array_equal(sm_p, perception)
    assert jnp.array_equal(sm_l, ltm)

    # 3) Pallas copy kernel (forced, so the HBM->HBM DMA path is exercised).
    cp_p, cp_l = memory_identity(perception, ltm, materialize=True,
                                 force_pallas=True)
    jax.block_until_ready((cp_p, cp_l))
    assert cp_p.shape == perception.shape and cp_l.shape == ltm.shape
    assert jnp.array_equal(cp_p, perception)
    assert jnp.array_equal(cp_l, ltm)

    print("KERNEL_OK")
</pallas_src>

<mosaic_0001>
module attributes {stable_mosaic.version = 11 : i64} {
  func.func @kernel(%arg0: memref<2x8x32xf32, #tpu.memory_space<any>>, %arg1: memref<2x16x32xf32, #tpu.memory_space<any>>, %arg2: memref<2x8x32xf32, #tpu.memory_space<any>>, %arg3: memref<2x16x32xf32, #tpu.memory_space<any>>, %arg4: memref<2x!tpu.dma_semaphore, #tpu.memory_space<semaphore_mem>>) attributes {dimension_semantics = [], scalar_prefetch = 0 : i64, scratch_operands = 1 : i64, tpu.core_type = #tpu.core_type<tc>} {
    %c0_i32 = arith.constant 0 : i32
    %0 = tpu.memref_slice %arg4[%c0_i32] : memref<2x!tpu.dma_semaphore, #tpu.memory_space<semaphore_mem>> -> memref<1x!tpu.dma_semaphore, #tpu.memory_space<semaphore_mem>>
    %1 = tpu.memref_squeeze %0 : memref<1x!tpu.dma_semaphore, #tpu.memory_space<semaphore_mem>> -> memref<!tpu.dma_semaphore, #tpu.memory_space<semaphore_mem>>
    tpu.enqueue_dma source(%arg0 : memref<2x8x32xf32, #tpu.memory_space<any>>) target(%arg2 : memref<2x8x32xf32, #tpu.memory_space<any>>) target_semaphore(%1 : memref<!tpu.dma_semaphore, #tpu.memory_space<semaphore_mem>>)
    %c1_i32 = arith.constant 1 : i32
    %2 = tpu.memref_slice %arg4[%c1_i32] : memref<2x!tpu.dma_semaphore, #tpu.memory_space<semaphore_mem>> -> memref<1x!tpu.dma_semaphore, #tpu.memory_space<semaphore_mem>>
    %3 = tpu.memref_squeeze %2 : memref<1x!tpu.dma_semaphore, #tpu.memory_space<semaphore_mem>> -> memref<!tpu.dma_semaphore, #tpu.memory_space<semaphore_mem>>
    tpu.enqueue_dma source(%arg1 : memref<2x16x32xf32, #tpu.memory_space<any>>) target(%arg3 : memref<2x16x32xf32, #tpu.memory_space<any>>) target_semaphore(%3 : memref<!tpu.dma_semaphore, #tpu.memory_space<semaphore_mem>>)
    %c0_i32_0 = arith.constant 0 : i32
    %4 = tpu.memref_slice %arg4[%c0_i32_0] : memref<2x!tpu.dma_semaphore, #tpu.memory_space<semaphore_mem>> -> memref<1x!tpu.dma_semaphore, #tpu.memory_space<semaphore_mem>>
    %5 = tpu.memref_squeeze %4 : memref<1x!tpu.dma_semaphore, #tpu.memory_space<semaphore_mem>> -> memref<!tpu.dma_semaphore, #tpu.memory_space<semaphore_mem>>
    tpu.wait_dma2 semaphore(%5 : memref<!tpu.dma_semaphore, #tpu.memory_space<semaphore_mem>>) src(%arg0 : memref<2x8x32xf32, #tpu.memory_space<any>>) dst(%arg2 : memref<2x8x32xf32, #tpu.memory_space<any>>)
    %c1_i32_1 = arith.constant 1 : i32
    %6 = tpu.memref_slice %arg4[%c1_i32_1] : memref<2x!tpu.dma_semaphore, #tpu.memory_space<semaphore_mem>> -> memref<1x!tpu.dma_semaphore, #tpu.memory_space<semaphore_mem>>
    %7 = tpu.memref_squeeze %6 : memref<1x!tpu.dma_semaphore, #tpu.memory_space<semaphore_mem>> -> memref<!tpu.dma_semaphore, #tpu.memory_space<semaphore_mem>>
    tpu.wait_dma2 semaphore(%7 : memref<!tpu.dma_semaphore, #tpu.memory_space<semaphore_mem>>) src(%arg1 : memref<2x16x32xf32, #tpu.memory_space<any>>) dst(%arg3 : memref<2x16x32xf32, #tpu.memory_space<any>>)
    return
  }
}

</mosaic_0001>

<bundles_post_ra>
// kernel: tpu_custom_call.1
= control target key start
LH: loop header
LB: loop body
LE: loop exit
PB: predicated region body
PF: predicated region fallthrough
CT: control target
= control target key end

     0   :  { %s68_s12 = smov [#allocation2]   ;;  %s69_s13 = smov [#allocation3]   ;;  %s105_s0 = inlined_call_operand.hbm [shape: f32[2,8,32], index: 0, kind: input, shape index: {}]   ;;  %s106_s2 = inlined_call_operand.hbm [shape: f32[2,8,32], index: 2, kind: output, shape index: {0}]   ;;  %s107_s1 = inlined_call_operand.hbm [shape: f32[2,16,32], index: 1, kind: input, shape index: {}]   ;;  %s108_s3 = inlined_call_operand.hbm [shape: f32[2,16,32], index: 3, kind: output, shape index: {1}]  }
   0x1   :  { %s70_s14 = smov 0   ;;  %s71_s19 = smov [#allocation2 + $0x1]  }
   0x2   :  { %21 = dma.general %s105_s0, 256, %s106_s2, %s68_s12, %s69_s13, [#allocation4], %s70_s14, 0  }
   0x3   :  { %s72_s20 = smov [#allocation5]  }
   0x4   :  { %35 = dma.general %s107_s1, 512, %s108_s3, %s71_s19, %s72_s20, [#allocation6], %s70_s14, 0  }
   0x5   :  { %64 = dma.done.wait [#allocation2], 256 }
   0x6   :  { %65 = vsyncadd [#allocation2], 4294967040 }
   0x7   :  { %66 = dma.done.wait [#allocation2 + $0x1], 512 }
   0x8   :  { %67 = vsyncadd [#allocation2 + $0x1], 4294966784 }
   0x9   :  { %44 = vsyncmov [#allocation2] }
   0xc   :  { %s45_s25 = vpop.sfrf %44 }
   0xd   :  { %p57_p0 = scmp.ne.s32.totalorder %s45_s25, 0 }
   0xf   :  { %49 = shalt.err (%p57_p0)  }
  0x10   :  { %51 = vsyncmov [#allocation2 + $0x1] }
  0x13   :  { %s52_s26 = vpop.sfrf %51 }
  0x14   :  { %p58_p1 = scmp.ne.s32.totalorder %s52_s26, 0 }
  0x16   :  { %56 = shalt.err (%p58_p1)  }

</bundles_post_ra>
